<compile_context>
chip_gen: v7x
topology: tpu7x:2x2x1
jax: 0.10.0
libtpu: 0.0.40
codegen_flags: <defaults>
</compile_context>

<pallas_src>
import functools

import numpy as np
import jax
import jax.numpy as jnp
from jax.experimental import pallas as pl
from jax.experimental.pallas import tpu as pltpu


# ----------------------------------------------------------------------------
# host-side glue: averaging matrix (torch AdaptiveAvgPool2d bins) + tap masks
# ----------------------------------------------------------------------------
def make_pool_matrix(H, W, k, Pp):
    P = H * W
    M = np.zeros((Pp, k * k), dtype=np.float32)       # zero rows for padded lanes
    for i in range(k):
        h0 = (i * H) // k
        h1 = ((i + 1) * H + k - 1) // k
        for j in range(k):
            w0 = (j * W) // k
            w1 = ((j + 1) * W + k - 1) // k
            cnt = float((h1 - h0) * (w1 - w0))
            for y in range(h0, h1):
                for x in range(w0, w1):
                    M[y * W + x, i * k + j] = 1.0 / cnt
    return jnp.asarray(M)


def make_tap_masks(H, W, k, Pp):
    """mask[t, p] = 1 iff depthwise tap t at flat position p stays in-bounds."""
    P = H * W
    pad = (k - 1) // 2
    ys, xs = np.divmod(np.arange(P), W)
    m = np.zeros((k * k, Pp), dtype=np.float32)       # padded lanes masked out
    for ky in range(k):
        for kx in range(k):
            dy, dx = ky - pad, kx - pad
            valid = ((ys + dy >= 0) & (ys + dy < H) &
                     (xs + dx >= 0) & (xs + dx < W))
            m[ky * k + kx, :P] = valid.astype(np.float32)
    return jnp.asarray(m)


def _tpu_vmem_capacity_bytes():
    """One generation-aware VMEM figure; drives both B sizing and vmem_limit."""
    try:
        cap = int(pltpu.get_tpu_info().vmem_capacity_bytes)
        if cap > 0:
            return cap
    except Exception:
        pass
    try:
        kind = jax.devices()[0].device_kind.lower()
    except Exception:
        kind = ""
    if ("v2" in kind) or ("v3" in kind):
        return 16 * 1024 * 1024
    if ("v4" in kind) or ("v5" in kind) or ("v6" in kind):
        return 128 * 1024 * 1024
    if "7" in kind:
        return 64 * 1024 * 1024
    return 64 * 1024 * 1024                            # unknown: v7x-conservative


# ----------------------------------------------------------------------------
# Pallas kernel: whole RAAM forward for B samples per grid step
# ----------------------------------------------------------------------------
def _raam_kernel(x_ref, pool_ref, mask_ref, conv_w_ref, conv_b_ref, dw_b_ref,
                 fuse_w_ref, fuse_b_ref, wn_w_ref, wn_b_ref,
                 bot_w1_ref, bot_w2_ref, bot_b_ref,
                 o_ref, acc_scr, *, B, W, Pp, K, Cq, matmul_dtype, tap_dtype):
    md = matmul_dtype
    x_md = x_ref[0]                                    # (C, B*Pp), matmul dtype
    xf = x_md.astype(jnp.float32)                      # f32 copy for elementwise

    conv_w = conv_w_ref[...]                           # (Cq, C)  md
    conv_b = conv_b_ref[...]                           # (Cq, 1)  f32

    # ---- RAM.conv over the whole block:  f = conv_w @ x + b
    f = jnp.dot(conv_w, x_md, preferred_element_type=jnp.float32) + conv_b  # (Cq, B*Pp) f32

    pool = pool_ref[...]                               # (Pp, K*K) f32
    dw_b = dw_b_ref[...]                               # (Cq, 1)   f32
    pad = (K - 1) // 2

    # ---- all B pooled-conv matmuls up front (decouples the underfilled N=9
    #      MXU results from the tap loops; pooling reads the f32 f).
    # conv(pool(x)) == pool(conv(x)) for a 1x1 conv (pool columns sum to 1).
    gb_all = [
        jnp.dot(f[:, b * Pp:(b + 1) * Pp], pool, preferred_element_type=jnp.float32)
        for b in range(B)
    ]                                                  # each (Cq, K*K) f32

    # ---- tap-constant data hoisted out of the per-sample loop
    masks = mask_ref[...]                              # (K*K, Pp), tap dtype
    taps = []
    for ky in range(K):
        for kx in range(K):
            t = ky * K + kx
            shift = (-((ky - pad) * W + (kx - pad))) % Pp
            taps.append((t, shift, masks[t:t + 1, :]))

    # ---- per-sample dynamic depthwise KxK conv (rolls never cross samples)
    for b in range(B):
        fb = f[:, b * Pp:(b + 1) * Pp].astype(tap_dtype)    # (Cq, Pp)
        gb = gb_all[b].astype(tap_dtype)                    # (Cq, K*K)
        acc = jnp.zeros((Cq, Pp), jnp.float32)
        for (t, shift, mk) in taps:
            shifted = fb if shift == 0 else pltpu.roll(fb, shift, axis=1)
            wk = gb[:, t:t + 1]                             # (Cq, 1) per-sample tap weight
            acc = acc + wk * (mk * shifted)                 # f32 accumulation
        # acc_scr is in matmul dtype: y is only ever consumed as an MXU operand.
        acc_scr[:, b * Pp:(b + 1) * Pp] = (acc + dw_b).astype(md)

    y_md = acc_scr[...]                                 # (Cq, B*Pp) md

    # ---- RAM.fuse (1x1 conv Cq -> C)
    region = (jnp.dot(fuse_w_ref[...], y_md, preferred_element_type=jnp.float32)
              + fuse_b_ref[...])                        # (C, B*Pp) f32

    # ---- RAAM: weights = sigmoid(weight_net(x - region))
    wfeat = xf - region
    wts = jax.nn.sigmoid(
        jnp.dot(wn_w_ref[...], wfeat.astype(md),
                preferred_element_type=jnp.float32) + wn_b_ref[...])
    feats_w = region * wts

    # ---- bottleneck 1x1 on concat([feats_w, x]) == two pre-split matmuls
    bot = (jnp.dot(bot_w1_ref[...], feats_w.astype(md),
                   preferred_element_type=jnp.float32)
           + jnp.dot(bot_w2_ref[...], x_md, preferred_element_type=jnp.float32)
           + bot_b_ref[...])
    o_ref[0] = jnp.maximum(bot, 0.0).astype(o_ref.dtype)


def raam_forward(x_nchw, params, k=3, samples_per_block=None,
                 matmul_dtype=jnp.bfloat16, tap_dtype=None, out_dtype=None):
    (conv_w, conv_b, dw_b, fuse_w, fuse_b,
     wn_w, wn_b, bot_w, bot_b) = params
    N, C, H, W = x_nchw.shape
    P = H * W
    Cq = C // 4
    Pp = ((P + 127) // 128) * 128                      # lane-dense spatial axis
    # NOTE: padded lanes [P, Pp) carry bias-derived garbage through the kernel
    # and are sliced off at the end; they cost HBM/VPU work proportional to
    # the padding fraction.
    out_dtype = x_nchw.dtype if out_dtype is None else out_dtype
    tap_dtype = jnp.float32 if tap_dtype is None else tap_dtype
    if matmul_dtype == jnp.float32:
        tap_dtype = jnp.float32

    # ---- single generation-aware VMEM figure -> vmem_limit and B budget ----
    vmem_cap = _tpu_vmem_capacity_bytes()
    vmem_limit = min((3 * vmem_cap) // 4, 100 * 1024 * 1024)
    data_budget = max(vmem_limit - 8 * 1024 * 1024, 4 * 1024 * 1024)
    mdb = jnp.dtype(matmul_dtype).itemsize
    odb = jnp.dtype(out_dtype).itemsize
    # double-buffered x/out blocks + md scratch + live f32 intermediates
    per_sample_bytes = Pp * (2 * C * mdb + 2 * C * odb + Cq * mdb + 8 * C * 4)

    if samples_per_block is None:
        B_cap = max(1, data_budget // max(per_sample_bytes, 1))
        B_cap = min(B_cap, max(1, 8192 // Pp), 16, N)  # bound RHS width & unroll size
        # nb >= 2 keeps both v7x TensorCores busy; B = ceil(N/nb) minimizes padding.
        nb = max(-(-N // B_cap), 2) if N >= 2 else 1
        B = -(-N // nb)
    else:
        B = max(1, min(samples_per_block, N))
        nb = -(-N // B)
    Np = nb * B
    L = B * Pp

    # ---- layout plumbing: NCHW -> (nb, C, B*Pp) blocks ----
    x = x_nchw.reshape(N, C, P).astype(jnp.float32)
    if Pp != P:
        x = jnp.pad(x, ((0, 0), (0, 0), (0, Pp - P)))
    if Np != N:
        x = jnp.pad(x, ((0, Np - N), (0, 0), (0, 0)))
    xb = (x.reshape(nb, B, C, Pp).transpose(0, 2, 1, 3)
           .reshape(nb, C, L).astype(matmul_dtype))

    pool_mat = make_pool_matrix(H, W, k, Pp)                       # f32 (accuracy)
    tap_masks = make_tap_masks(H, W, k, Pp).astype(tap_dtype)      # exact 0/1

    col = lambda v: v.reshape(-1, 1).astype(jnp.float32)
    wcast = lambda m: m.astype(matmul_dtype)
    bot_w1 = wcast(bot_w[:, :C])                       # acts on region * weights
    bot_w2 = wcast(bot_w[:, C:])                       # acts on the x (skip) path

    def full_spec(shape):
        nd = len(shape)
        return pl.BlockSpec(shape, lambda n: (0,) * nd)

    kernel = functools.partial(_raam_kernel, B=B, W=W, Pp=Pp, K=k, Cq=Cq,
                               matmul_dtype=matmul_dtype, tap_dtype=tap_dtype)

    out = pl.pallas_call(
        kernel,
        out_shape=jax.ShapeDtypeStruct((nb, C, L), out_dtype),
        grid=(nb,),
        in_specs=[
            pl.BlockSpec((1, C, L), lambda n: (n, 0, 0)),   # x block
            full_spec((Pp, k * k)),                         # pooling matrix (f32)
            full_spec((k * k, Pp)),                         # tap boundary masks
            full_spec((Cq, C)), full_spec((Cq, 1)),         # RAM.conv w, b
            full_spec((Cq, 1)),                             # RAM.dw_conv bias
            full_spec((C, Cq)), full_spec((C, 1)),          # RAM.fuse w, b
            full_spec((C, C)), full_spec((C, 1)),           # weight_net w, b
            full_spec((C, C)), full_spec((C, C)),           # bottleneck w (pre-split)
            full_spec((C, 1)),                              # bottleneck b
        ],
        out_specs=pl.BlockSpec((1, C, L), lambda n: (n, 0, 0)),
        scratch_shapes=[pltpu.VMEM((Cq, L), matmul_dtype)],  # y staging in md
        compiler_params=pltpu.CompilerParams(
            dimension_semantics=("parallel",),              # independent batch blocks
            vmem_limit_bytes=int(vmem_limit)),
    )(xb, pool_mat, tap_masks,
      wcast(conv_w), col(conv_b), col(dw_b),
      wcast(fuse_w), col(fuse_b),
      wcast(wn_w), col(wn_b),
      bot_w1, bot_w2, col(bot_b))

    out = (out.reshape(nb, C, B, Pp).transpose(0, 2, 1, 3)
              .reshape(Np, C, Pp)[:N, :, :P].reshape(N, C, H, W))
    return out


# ----------------------------------------------------------------------------
# pure-JAX reference (mirrors the PyTorch forward exactly)
# ----------------------------------------------------------------------------
def raam_reference(x, params, k=3):
    (conv_w, conv_b, dw_b, fuse_w, fuse_b,
     wn_w, wn_b, bot_w, bot_b) = params
    N, C, H, W = x.shape
    Cq = C // 4

    f = jnp.einsum('oc,nchw->nohw', conv_w, x) + conv_b[None, :, None, None]

    bins_h = [((i * H) // k, ((i + 1) * H + k - 1) // k) for i in range(k)]
    bins_w = [((j * W) // k, ((j + 1) * W + k - 1) // k) for j in range(k)]
    pooled = jnp.stack(
        [jnp.stack([x[:, :, h0:h1, w0:w1].mean(axis=(2, 3)) for (w0, w1) in bins_w],
                   axis=-1) for (h0, h1) in bins_h], axis=-2)      # (N, C, k, k)
    g = jnp.einsum('oc,ncij->noij', conv_w, pooled) + conv_b[None, :, None, None]

    outs = []
    pad = (k - 1) // 2
    for n in range(N):
        o = jax.lax.conv_general_dilated(
            f[n:n + 1], g[n][:, None, :, :],
            window_strides=(1, 1), padding=((pad, pad), (pad, pad)),
            feature_group_count=Cq,
            dimension_numbers=('NCHW', 'OIHW', 'NCHW'))
        outs.append(o)
    y = jnp.concatenate(outs, axis=0) + dw_b[None, :, None, None]

    region = jnp.einsum('oc,nchw->nohw', fuse_w, y) + fuse_b[None, :, None, None]
    wts = jax.nn.sigmoid(jnp.einsum('oc,nchw->nohw', wn_w, x - region)
                         + wn_b[None, :, None, None])
    features = region * wts
    cat = jnp.concatenate([features, x], axis=1)
    bot = jnp.einsum('oc,nchw->nohw', bot_w, cat) + bot_b[None, :, None, None]
    return jax.nn.relu(bot)


# ----------------------------------------------------------------------------
if __name__ == "__main__":
    # features == out_features (required for the module's forward to typecheck)
    N, C, H, W = 2, 8, 16, 16
    Cq = C // 4

    key = jax.random.PRNGKey(0)
    ks = jax.random.split(key, 10)
    params = (
        jax.random.normal(ks[0], (Cq, C), jnp.float32) * 0.2,      # RAM.conv.w (1x1)
        jax.random.normal(ks[1], (Cq,), jnp.float32) * 0.1,        # RAM.conv.b
        jax.random.normal(ks[2], (Cq,), jnp.float32) * 0.1,        # RAM.dw_conv.b
        jax.random.normal(ks[3], (C, Cq), jnp.float32) * 0.2,      # RAM.fuse.w (1x1)
        jax.random.normal(ks[4], (C,), jnp.float32) * 0.1,         # RAM.fuse.b
        jax.random.normal(ks[5], (C, C), jnp.float32) * 0.2,       # weight_net.w (1x1)
        jax.random.normal(ks[6], (C,), jnp.float32) * 0.1,         # weight_net.b
        jax.random.normal(ks[7], (C, 2 * C), jnp.float32) * 0.2,   # bottleneck.w (1x1)
        jax.random.normal(ks[8], (C,), jnp.float32) * 0.1,         # bottleneck.b
    )
    x = jax.random.normal(ks[9], (N, C, H, W), jnp.float32)

    ref = jax.block_until_ready(raam_reference(x, params))

    # f32 MXU path: tight check (identical math, only pool/conv reassociation).
    out_f32 = jax.block_until_ready(
        raam_forward(x, params, matmul_dtype=jnp.float32))
    np.testing.assert_allclose(np.asarray(out_f32), np.asarray(ref),
                               rtol=5e-3, atol=5e-4)

    # Default bf16-MXU path (f32 accumulation, f32 elementwise/output).
    out_bf16 = jax.block_until_ready(raam_forward(x, params))
    np.testing.assert_allclose(np.asarray(out_bf16), np.asarray(ref),
                               rtol=3e-2, atol=3e-2)

    # bf16 output writeback (review: halves the output HBM traffic).
    out_bf16_o = jax.block_until_ready(
        raam_forward(x, params, out_dtype=jnp.bfloat16))
    np.testing.assert_allclose(np.asarray(out_bf16_o).astype(np.float32),
                               np.asarray(ref), rtol=4e-2, atol=4e-2)

    print("KERNEL_OK")
</pallas_src>

<mosaic_0001>
module attributes {stable_mosaic.version = 11 : i64} {
  func.func @_raam_kernel(%arg0: i32, %arg1: memref<1x8x256xf32, #tpu.memory_space<vmem>>, %arg2: memref<256x9xf32, #tpu.memory_space<vmem>>, %arg3: memref<9x256xf32, #tpu.memory_space<vmem>>, %arg4: memref<2x8xf32, #tpu.memory_space<vmem>>, %arg5: memref<2x1xf32, #tpu.memory_space<vmem>>, %arg6: memref<2x1xf32, #tpu.memory_space<vmem>>, %arg7: memref<8x2xf32, #tpu.memory_space<vmem>>, %arg8: memref<8x1xf32, #tpu.memory_space<vmem>>, %arg9: memref<8x8xf32, #tpu.memory_space<vmem>>, %arg10: memref<8x1xf32, #tpu.memory_space<vmem>>, %arg11: memref<8x8xf32, #tpu.memory_space<vmem>>, %arg12: memref<8x8xf32, #tpu.memory_space<vmem>>, %arg13: memref<8x1xf32, #tpu.memory_space<vmem>>, %arg14: memref<1x8x256xf32, #tpu.memory_space<vmem>>, %arg15: memref<2x256xf32, #tpu.memory_space<vmem>>) attributes {dimension_semantics = [#tpu.dimension_semantics<parallel>], iteration_bounds = array<i64: 2>, scalar_prefetch = 0 : i64, scratch_operands = 1 : i64, tpu.core_type = #tpu.core_type<tc>, window_params = [{transform_indices = @transform_0, window_bounds = array<i64: 1, 8, 256>}, {pipeline_mode = #tpu.pipeline_mode<synchronous>, transform_indices = @transform_1, window_bounds = array<i64: 256, 9>}, {pipeline_mode = #tpu.pipeline_mode<synchronous>, transform_indices = @transform_2, window_bounds = array<i64: 9, 256>}, {pipeline_mode = #tpu.pipeline_mode<synchronous>, transform_indices = @transform_3, window_bounds = array<i64: 2, 8>}, {pipeline_mode = #tpu.pipeline_mode<synchronous>, transform_indices = @transform_4, window_bounds = array<i64: 2, 1>}, {pipeline_mode = #tpu.pipeline_mode<synchronous>, transform_indices = @transform_5, window_bounds = array<i64: 2, 1>}, {pipeline_mode = #tpu.pipeline_mode<synchronous>, transform_indices = @transform_6, window_bounds = array<i64: 8, 2>}, {pipeline_mode = #tpu.pipeline_mode<synchronous>, transform_indices = @transform_7, window_bounds = array<i64: 8, 1>}, {pipeline_mode = #tpu.pipeline_mode<synchronous>, transform_indices = @transform_8, window_bounds = array<i64: 8, 8>}, {pipeline_mode = #tpu.pipeline_mode<synchronous>, transform_indices = @transform_9, window_bounds = array<i64: 8, 1>}, {pipeline_mode = #tpu.pipeline_mode<synchronous>, transform_indices = @transform_10, window_bounds = array<i64: 8, 8>}, {pipeline_mode = #tpu.pipeline_mode<synchronous>, transform_indices = @transform_11, window_bounds = array<i64: 8, 8>}, {pipeline_mode = #tpu.pipeline_mode<synchronous>, transform_indices = @transform_12, window_bounds = array<i64: 8, 1>}, {transform_indices = @transform_13, window_bounds = array<i64: 1, 8, 256>}]} {
    %c0 = arith.constant 0 : index
    %c0_0 = arith.constant 0 : index
    %c0_1 = arith.constant 0 : index
    %0 = vector.load %arg1[%c0, %c0_0, %c0_1] : memref<1x8x256xf32, #tpu.memory_space<vmem>>, vector<1x8x256xf32>
    %1 = vector.shape_cast %0 : vector<1x8x256xf32> to vector<8x256xf32>
    %c0_2 = arith.constant 0 : index
    %c0_3 = arith.constant 0 : index
    %2 = vector.load %arg4[%c0_2, %c0_3] : memref<2x8xf32, #tpu.memory_space<vmem>>, vector<2x8xf32>
    %c0_4 = arith.constant 0 : index
    %c0_5 = arith.constant 0 : index
    %3 = vector.load %arg5[%c0_4, %c0_5] : memref<2x1xf32, #tpu.memory_space<vmem>>, vector<2x1xf32>
    %cst = arith.constant dense<0.000000e+00> : vector<2x256xf32>
    %4 = tpu.matmul %2, %1, %cst {dimension_numbers = #tpu.dot_dimension_numbers<[1], [0], [0], [1], [0, 0, 1, 1], [], []>} : vector<2x8xf32>, vector<8x256xf32>, vector<2x256xf32> -> vector<2x256xf32>
    %5 = vector.broadcast %3 : vector<2x1xf32> to vector<2x256xf32>
    %6 = arith.addf %4, %5 : vector<2x256xf32>
    %c0_6 = arith.constant 0 : index
    %c0_7 = arith.constant 0 : index
    %7 = vector.load %arg2[%c0_6, %c0_7] : memref<256x9xf32, #tpu.memory_space<vmem>>, vector<256x9xf32>
    %c0_8 = arith.constant 0 : index
    %c0_9 = arith.constant 0 : index
    %8 = vector.load %arg6[%c0_8, %c0_9] : memref<2x1xf32, #tpu.memory_space<vmem>>, vector<2x1xf32>
    %cst_10 = arith.constant dense<0.000000e+00> : vector<2x9xf32>
    %9 = tpu.matmul %6, %7, %cst_10 {dimension_numbers = #tpu.dot_dimension_numbers<[1], [0], [0], [1], [0, 0, 1, 1], [], []>} : vector<2x256xf32>, vector<256x9xf32>, vector<2x9xf32> -> vector<2x9xf32>
    %c0_11 = arith.constant 0 : index
    %c0_12 = arith.constant 0 : index
    %10 = vector.load %arg3[%c0_11, %c0_12] : memref<9x256xf32, #tpu.memory_space<vmem>>, vector<9x256xf32>
    %11 = vector.extract_strided_slice %10 {offsets = [0, 0], sizes = [1, 256], strides = [1, 1]} : vector<9x256xf32> to vector<1x256xf32>
    %12 = vector.extract_strided_slice %10 {offsets = [1, 0], sizes = [1, 256], strides = [1, 1]} : vector<9x256xf32> to vector<1x256xf32>
    %13 = vector.extract_strided_slice %10 {offsets = [2, 0], sizes = [1, 256], strides = [1, 1]} : vector<9x256xf32> to vector<1x256xf32>
    %14 = vector.extract_strided_slice %10 {offsets = [3, 0], sizes = [1, 256], strides = [1, 1]} : vector<9x256xf32> to vector<1x256xf32>
    %15 = vector.extract_strided_slice %10 {offsets = [4, 0], sizes = [1, 256], strides = [1, 1]} : vector<9x256xf32> to vector<1x256xf32>
    %16 = vector.extract_strided_slice %10 {offsets = [5, 0], sizes = [1, 256], strides = [1, 1]} : vector<9x256xf32> to vector<1x256xf32>
    %17 = vector.extract_strided_slice %10 {offsets = [6, 0], sizes = [1, 256], strides = [1, 1]} : vector<9x256xf32> to vector<1x256xf32>
    %18 = vector.extract_strided_slice %10 {offsets = [7, 0], sizes = [1, 256], strides = [1, 1]} : vector<9x256xf32> to vector<1x256xf32>
    %19 = vector.extract_strided_slice %10 {offsets = [8, 0], sizes = [1, 256], strides = [1, 1]} : vector<9x256xf32> to vector<1x256xf32>
    %cst_13 = arith.constant 0.000000e+00 : f32
    %20 = vector.broadcast %cst_13 : f32 to vector<2x256xf32>
    %c17_i32 = arith.constant 17 : i32
    %21 = tpu.dynamic_rotate %6 by %c17_i32 dim 1 : vector<2x256xf32>, i32 -> vector<2x256xf32>
    %22 = vector.extract_strided_slice %9 {offsets = [0, 0], sizes = [2, 1], strides = [1, 1]} : vector<2x9xf32> to vector<2x1xf32>
    %23 = vector.broadcast %11 : vector<1x256xf32> to vector<2x256xf32>
    %24 = arith.mulf %23, %21 : vector<2x256xf32>
    %25 = vector.broadcast %22 : vector<2x1xf32> to vector<2x256xf32>
    %26 = arith.mulf %25, %24 : vector<2x256xf32>
    %27 = arith.addf %20, %26 : vector<2x256xf32>
    %c16_i32 = arith.constant 16 : i32
    %28 = tpu.dynamic_rotate %6 by %c16_i32 dim 1 : vector<2x256xf32>, i32 -> vector<2x256xf32>
    %29 = vector.extract_strided_slice %9 {offsets = [0, 1], sizes = [2, 1], strides = [1, 1]} : vector<2x9xf32> to vector<2x1xf32>
    %30 = vector.broadcast %12 : vector<1x256xf32> to vector<2x256xf32>
    %31 = arith.mulf %30, %28 : vector<2x256xf32>
    %32 = vector.broadcast %29 : vector<2x1xf32> to vector<2x256xf32>
    %33 = arith.mulf %32, %31 : vector<2x256xf32>
    %34 = arith.addf %27, %33 : vector<2x256xf32>
    %c15_i32 = arith.constant 15 : i32
    %35 = tpu.dynamic_rotate %6 by %c15_i32 dim 1 : vector<2x256xf32>, i32 -> vector<2x256xf32>
    %36 = vector.extract_strided_slice %9 {offsets = [0, 2], sizes = [2, 1], strides = [1, 1]} : vector<2x9xf32> to vector<2x1xf32>
    %37 = vector.broadcast %13 : vector<1x256xf32> to vector<2x256xf32>
    %38 = arith.mulf %37, %35 : vector<2x256xf32>
    %39 = vector.broadcast %36 : vector<2x1xf32> to vector<2x256xf32>
    %40 = arith.mulf %39, %38 : vector<2x256xf32>
    %41 = arith.addf %34, %40 : vector<2x256xf32>
    %c1_i32 = arith.constant 1 : i32
    %42 = tpu.dynamic_rotate %6 by %c1_i32 dim 1 : vector<2x256xf32>, i32 -> vector<2x256xf32>
    %43 = vector.extract_strided_slice %9 {offsets = [0, 3], sizes = [2, 1], strides = [1, 1]} : vector<2x9xf32> to vector<2x1xf32>
    %44 = vector.broadcast %14 : vector<1x256xf32> to vector<2x256xf32>
    %45 = arith.mulf %44, %42 : vector<2x256xf32>
    %46 = vector.broadcast %43 : vector<2x1xf32> to vector<2x256xf32>
    %47 = arith.mulf %46, %45 : vector<2x256xf32>
    %48 = arith.addf %41, %47 : vector<2x256xf32>
    %49 = vector.extract_strided_slice %9 {offsets = [0, 4], sizes = [2, 1], strides = [1, 1]} : vector<2x9xf32> to vector<2x1xf32>
    %50 = vector.broadcast %15 : vector<1x256xf32> to vector<2x256xf32>
    %51 = arith.mulf %50, %6 : vector<2x256xf32>
    %52 = vector.broadcast %49 : vector<2x1xf32> to vector<2x256xf32>
    %53 = arith.mulf %52, %51 : vector<2x256xf32>
    %54 = arith.addf %48, %53 : vector<2x256xf32>
    %c255_i32 = arith.constant 255 : i32
    %55 = tpu.dynamic_rotate %6 by %c255_i32 dim 1 : vector<2x256xf32>, i32 -> vector<2x256xf32>
    %56 = vector.extract_strided_slice %9 {offsets = [0, 5], sizes = [2, 1], strides = [1, 1]} : vector<2x9xf32> to vector<2x1xf32>
    %57 = vector.broadcast %16 : vector<1x256xf32> to vector<2x256xf32>
    %58 = arith.mulf %57, %55 : vector<2x256xf32>
    %59 = vector.broadcast %56 : vector<2x1xf32> to vector<2x256xf32>
    %60 = arith.mulf %59, %58 : vector<2x256xf32>
    %61 = arith.addf %54, %60 : vector<2x256xf32>
    %c241_i32 = arith.constant 241 : i32
    %62 = tpu.dynamic_rotate %6 by %c241_i32 dim 1 : vector<2x256xf32>, i32 -> vector<2x256xf32>
    %63 = vector.extract_strided_slice %9 {offsets = [0, 6], sizes = [2, 1], strides = [1, 1]} : vector<2x9xf32> to vector<2x1xf32>
    %64 = vector.broadcast %17 : vector<1x256xf32> to vector<2x256xf32>
    %65 = arith.mulf %64, %62 : vector<2x256xf32>
    %66 = vector.broadcast %63 : vector<2x1xf32> to vector<2x256xf32>
    %67 = arith.mulf %66, %65 : vector<2x256xf32>
    %68 = arith.addf %61, %67 : vector<2x256xf32>
    %c240_i32 = arith.constant 240 : i32
    %69 = tpu.dynamic_rotate %6 by %c240_i32 dim 1 : vector<2x256xf32>, i32 -> vector<2x256xf32>
    %70 = vector.extract_strided_slice %9 {offsets = [0, 7], sizes = [2, 1], strides = [1, 1]} : vector<2x9xf32> to vector<2x1xf32>
    %71 = vector.broadcast %18 : vector<1x256xf32> to vector<2x256xf32>
    %72 = arith.mulf %71, %69 : vector<2x256xf32>
    %73 = vector.broadcast %70 : vector<2x1xf32> to vector<2x256xf32>
    %74 = arith.mulf %73, %72 : vector<2x256xf32>
    %75 = arith.addf %68, %74 : vector<2x256xf32>
    %c239_i32 = arith.constant 239 : i32
    %76 = tpu.dynamic_rotate %6 by %c239_i32 dim 1 : vector<2x256xf32>, i32 -> vector<2x256xf32>
    %77 = vector.extract_strided_slice %9 {offsets = [0, 8], sizes = [2, 1], strides = [1, 1]} : vector<2x9xf32> to vector<2x1xf32>
    %78 = vector.broadcast %19 : vector<1x256xf32> to vector<2x256xf32>
    %79 = arith.mulf %78, %76 : vector<2x256xf32>
    %80 = vector.broadcast %77 : vector<2x1xf32> to vector<2x256xf32>
    %81 = arith.mulf %80, %79 : vector<2x256xf32>
    %82 = arith.addf %75, %81 : vector<2x256xf32>
    %83 = vector.broadcast %8 : vector<2x1xf32> to vector<2x256xf32>
    %84 = arith.addf %82, %83 : vector<2x256xf32>
    %c0_14 = arith.constant 0 : index
    %c0_15 = arith.constant 0 : index
    %85 = vector.load %arg15[%c0_14, %c0_15] : memref<2x256xf32, #tpu.memory_space<vmem>>, vector<2x256xf32>
    tpu.vector_store %arg15[%c0_14, %c0_15], %84 {strides = array<i32>} : memref<2x256xf32, #tpu.memory_space<vmem>>, vector<2x256xf32>,
    %c0_16 = arith.constant 0 : index
    %c0_17 = arith.constant 0 : index
    %86 = vector.load %arg15[%c0_16, %c0_17] : memref<2x256xf32, #tpu.memory_space<vmem>>, vector<2x256xf32>
    %c0_18 = arith.constant 0 : index
    %c0_19 = arith.constant 0 : index
    %87 = vector.load %arg7[%c0_18, %c0_19] : memref<8x2xf32, #tpu.memory_space<vmem>>, vector<8x2xf32>
    %cst_20 = arith.constant dense<0.000000e+00> : vector<8x256xf32>
    %88 = tpu.matmul %87, %86, %cst_20 {dimension_numbers = #tpu.dot_dimension_numbers<[1], [0], [0], [1], [0, 0, 1, 1], [], []>} : vector<8x2xf32>, vector<2x256xf32>, vector<8x256xf32> -> vector<8x256xf32>
    %c0_21 = arith.constant 0 : index
    %c0_22 = arith.constant 0 : index
    %89 = vector.load %arg8[%c0_21, %c0_22] : memref<8x1xf32, #tpu.memory_space<vmem>>, vector<8x1xf32>
    %90 = vector.broadcast %89 : vector<8x1xf32> to vector<8x256xf32>
    %91 = arith.addf %88, %90 : vector<8x256xf32>
    %92 = arith.subf %1, %91 : vector<8x256xf32>
    %c0_23 = arith.constant 0 : index
    %c0_24 = arith.constant 0 : index
    %93 = vector.load %arg9[%c0_23, %c0_24] : memref<8x8xf32, #tpu.memory_space<vmem>>, vector<8x8xf32>
    %cst_25 = arith.constant dense<0.000000e+00> : vector<8x256xf32>
    %94 = tpu.matmul %93, %92, %cst_25 {dimension_numbers = #tpu.dot_dimension_numbers<[1], [0], [0], [1], [0, 0, 1, 1], [], []>} : vector<8x8xf32>, vector<8x256xf32>, vector<8x256xf32> -> vector<8x256xf32>
    %c0_26 = arith.constant 0 : index
    %c0_27 = arith.constant 0 : index
    %95 = vector.load %arg10[%c0_26, %c0_27] : memref<8x1xf32, #tpu.memory_space<vmem>>, vector<8x1xf32>
    %96 = vector.broadcast %95 : vector<8x1xf32> to vector<8x256xf32>
    %97 = arith.addf %94, %96 : vector<8x256xf32>
    %98 = arith.negf %97 : vector<8x256xf32>
    %99 = math.exp %98 : vector<8x256xf32>
    %cst_28 = arith.constant 1.000000e+00 : f32
    %100 = vector.broadcast %cst_28 : f32 to vector<8x256xf32>
    %101 = arith.addf %100, %99 : vector<8x256xf32>
    %102 = arith.divf %100, %101 : vector<8x256xf32>
    %103 = arith.mulf %91, %102 : vector<8x256xf32>
    %c0_29 = arith.constant 0 : index
    %c0_30 = arith.constant 0 : index
    %104 = vector.load %arg11[%c0_29, %c0_30] : memref<8x8xf32, #tpu.memory_space<vmem>>, vector<8x8xf32>
    %cst_31 = arith.constant dense<0.000000e+00> : vector<8x256xf32>
    %105 = tpu.matmul %104, %103, %cst_31 {dimension_numbers = #tpu.dot_dimension_numbers<[1], [0], [0], [1], [0, 0, 1, 1], [], []>} : vector<8x8xf32>, vector<8x256xf32>, vector<8x256xf32> -> vector<8x256xf32>
    %c0_32 = arith.constant 0 : index
    %c0_33 = arith.constant 0 : index
    %106 = vector.load %arg12[%c0_32, %c0_33] : memref<8x8xf32, #tpu.memory_space<vmem>>, vector<8x8xf32>
    %cst_34 = arith.constant dense<0.000000e+00> : vector<8x256xf32>
    %107 = tpu.matmul %106, %1, %cst_34 {dimension_numbers = #tpu.dot_dimension_numbers<[1], [0], [0], [1], [0, 0, 1, 1], [], []>} : vector<8x8xf32>, vector<8x256xf32>, vector<8x256xf32> -> vector<8x256xf32>
    %108 = arith.addf %105, %107 : vector<8x256xf32>
    %c0_35 = arith.constant 0 : index
    %c0_36 = arith.constant 0 : index
    %109 = vector.load %arg13[%c0_35, %c0_36] : memref<8x1xf32, #tpu.memory_space<vmem>>, vector<8x1xf32>
    %110 = vector.broadcast %109 : vector<8x1xf32> to vector<8x256xf32>
    %111 = arith.addf %108, %110 : vector<8x256xf32>
    %cst_37 = arith.constant 0.000000e+00 : f32
    %112 = vector.broadcast %cst_37 : f32 to vector<8x256xf32>
    %113 = arith.maximumf %111, %112 : vector<8x256xf32>
    %c0_38 = arith.constant 0 : index
    %c0_39 = arith.constant 0 : index
    %c0_40 = arith.constant 0 : index
    %114 = vector.load %arg14[%c0_38, %c0_39, %c0_40] : memref<1x8x256xf32, #tpu.memory_space<vmem>>, vector<1x8x256xf32>
    %115 = vector.shape_cast %114 : vector<1x8x256xf32> to vector<8x256xf32>
    %116 = vector.shape_cast %113 : vector<8x256xf32> to vector<1x8x256xf32>
    tpu.vector_store %arg14[%c0_38, %c0_39, %c0_40], %116 {strides = array<i32>} : memref<1x8x256xf32, #tpu.memory_space<vmem>>, vector<1x8x256xf32>,
    return
  }
  func.func @transform_0(%arg0: i32) -> (i32, i32, i32) {
    %c0_i32 = arith.constant 0 : i32
    %c0_i32_0 = arith.constant 0 : i32
    %c0_i32_1 = arith.constant 0 : i32
    return %arg0, %c0_i32, %c0_i32_0 : i32, i32, i32
  }
  func.func @transform_1(%arg0: i32) -> (i32, i32) {
    %c0_i32 = arith.constant 0 : i32
    %c0_i32_0 = arith.constant 0 : i32
    %c0_i32_1 = arith.constant 0 : i32
    return %c0_i32, %c0_i32_0 : i32, i32
  }
  func.func @transform_2(%arg0: i32) -> (i32, i32) {
    %c0_i32 = arith.constant 0 : i32
    %c0_i32_0 = arith.constant 0 : i32
    %c0_i32_1 = arith.constant 0 : i32
    return %c0_i32, %c0_i32_0 : i32, i32
  }
  func.func @transform_3(%arg0: i32) -> (i32, i32) {
    %c0_i32 = arith.constant 0 : i32
    %c0_i32_0 = arith.constant 0 : i32
    %c0_i32_1 = arith.constant 0 : i32
    return %c0_i32, %c0_i32_0 : i32, i32
  }
  func.func @transform_4(%arg0: i32) -> (i32, i32) {
    %c0_i32 = arith.constant 0 : i32
    %c0_i32_0 = arith.constant 0 : i32
    %c0_i32_1 = arith.constant 0 : i32
    return %c0_i32, %c0_i32_0 : i32, i32
  }
  func.func @transform_5(%arg0: i32) -> (i32, i32) {
    %c0_i32 = arith.constant 0 : i32
    %c0_i32_0 = arith.constant 0 : i32
    %c0_i32_1 = arith.constant 0 : i32
    return %c0_i32, %c0_i32_0 : i32, i32
  }
  func.func @transform_6(%arg0: i32) -> (i32, i32) {
    %c0_i32 = arith.constant 0 : i32
    %c0_i32_0 = arith.constant 0 : i32
    %c0_i32_1 = arith.constant 0 : i32
    return %c0_i32, %c0_i32_0 : i32, i32
  }
  func.func @transform_7(%arg0: i32) -> (i32, i32) {
    %c0_i32 = arith.constant 0 : i32
    %c0_i32_0 = arith.constant 0 : i32
    %c0_i32_1 = arith.constant 0 : i32
    return %c0_i32, %c0_i32_0 : i32, i32
  }
  func.func @transform_8(%arg0: i32) -> (i32, i32) {
    %c0_i32 = arith.constant 0 : i32
    %c0_i32_0 = arith.constant 0 : i32
    %c0_i32_1 = arith.constant 0 : i32
    return %c0_i32, %c0_i32_0 : i32, i32
  }
  func.func @transform_9(%arg0: i32) -> (i32, i32) {
    %c0_i32 = arith.constant 0 : i32
    %c0_i32_0 = arith.constant 0 : i32
    %c0_i32_1 = arith.constant 0 : i32
    return %c0_i32, %c0_i32_0 : i32, i32
  }
  func.func @transform_10(%arg0: i32) -> (i32, i32) {
    %c0_i32 = arith.constant 0 : i32
    %c0_i32_0 = arith.constant 0 : i32
    %c0_i32_1 = arith.constant 0 : i32
    return %c0_i32, %c0_i32_0 : i32, i32
  }
  func.func @transform_11(%arg0: i32) -> (i32, i32) {
    %c0_i32 = arith.constant 0 : i32
    %c0_i32_0 = arith.constant 0 : i32
    %c0_i32_1 = arith.constant 0 : i32
    return %c0_i32, %c0_i32_0 : i32, i32
  }
  func.func @transform_12(%arg0: i32) -> (i32, i32) {
    %c0_i32 = arith.constant 0 : i32
    %c0_i32_0 = arith.constant 0 : i32
    %c0_i32_1 = arith.constant 0 : i32
    return %c0_i32, %c0_i32_0 : i32, i32
  }
  func.func @transform_13(%arg0: i32) -> (i32, i32, i32) {
    %c0_i32 = arith.constant 0 : i32
    %c0_i32_0 = arith.constant 0 : i32
    %c0_i32_1 = arith.constant 0 : i32
    return %arg0, %c0_i32, %c0_i32_0 : i32, i32, i32
  }
}

</mosaic_0001>

<bundles_post_ra>
// kernel: tpu_custom_call.1
= control target key start
LH: loop header
LB: loop body
LE: loop exit
PB: predicated region body
PF: predicated region fallthrough
CT: control target
= control target key end

     0   :  { %s1967_s0 = inlined_call_operand.vmem [shape: f32[2,8,256], index: 0, kind: input, shape index: {}]   ;;  %s1968_s1 = inlined_call_operand.vmem [shape: f32[256,9], index: 1, kind: input, shape index: {}]   ;;  %s1969_s2 = inlined_call_operand.vmem [shape: f32[9,256], index: 2, kind: input, shape index: {}]   ;;  %s1970_s3 = inlined_call_operand.vmem [shape: f32[2,8], index: 3, kind: input, shape index: {}]   ;;  %s1971_s4 = inlined_call_operand.vmem [shape: f32[2,1], index: 4, kind: input, shape index: {}]   ;;  %s1972_s5 = inlined_call_operand.vmem [shape: f32[2,1], index: 5, kind: input, shape index: {}]   ;;  %s1973_s6 = inlined_call_operand.vmem [shape: f32[8,2], index: 6, kind: input, shape index: {}]   ;;  %s1974_s7 = inlined_call_operand.vmem [shape: f32[8,1], index: 7, kind: input, shape index: {}]   ;;  %s1975_s8 = inlined_call_operand.vmem [shape: f32[8,8], index: 8, kind: input, shape index: {}]   ;;  %s1976_s9 = inlined_call_operand.vmem [shape: f32[8,1], index: 9, kind: input, shape index: {}]   ;;  %s1977_s10 = inlined_call_operand.vmem [shape: f32[8,8], index: 10, kind: input, shape index: {}]   ;;  %s1978_s11 = inlined_call_operand.vmem [shape: f32[8,8], index: 11, kind: input, shape index: {}]   ;;  %s1979_s12 = inlined_call_operand.vmem [shape: f32[8,1], index: 12, kind: input, shape index: {}]   ;;  %s1980_s13 = inlined_call_operand.hbm [shape: f32[2,8,256], index: 13, kind: output, shape index: {}]  }
   0x1   :  { %1985 = sst [smem:[#allocation10_spill]] %s1971_s4 }
   0x2   :  { %18 = vsyncpa [#allocation4], 0 }
   0x3   :  { %20 = vsyncpa [#allocation4 + $0x1], 0  ;;  %s1625_s25 = smov 0   ;;  %s1627_s26 = smov 0  }
   0x4   :  { %s1629_s27 = smov 0   ;;  %s1631_s28 = smov 0  }
   0x5 LB: > { %1986 = sst [smem:[#allocation6_spill]] %s1530_s27  ;;  %s1646_s29 = sadd.s32 4294967295, %s1534_s28   ;;  %s1534_s28 = sphi %s1631_s28, %s1994_s28   ;;  %s1530_s27 = sphi %s1629_s27, %s1996_s27   ;;  %s1526_s26 = sphi %s1627_s26, %s1998_s26   ;;  %s1522_s25 = sphi %s1625_s25, %s1997_s25  }
   0x6   : > { %s1300_s30 = sadd.s32 4294967294, %s1534_s28   ;;  %s1650_s14 = sadd.s32 1, %s1534_s28  }
   0x7   : > { %1987 = sst [smem:[#allocation7_spill]] %s1650_s14  ;;  %s311_s15 = sadd.s32 1, %s1530_s27 }
   0x8   : > { %s308_s16 = ssub.s32 %s1534_s28, %s1650_s14  ;;  %p321_p0 = scmp.ne.s32.totalorder %s1530_s27, %s1526_s26 }
   0x9   : > { %p309_p1 = scmp.eq.s32.totalorder %s308_s16, 0  ;;  %p322_p2 = scmp.eq.s32.totalorder %s1646_s29, 1 }
   0xa   : > { %p327_p3 = scmp.ne.s32.totalorder %s1526_s26, %s1522_s25  ;;  %p328_p4 = scmp.eq.s32.totalorder %s1300_s30, 1 }
   0xb   : > { %s1661_s17 = scalar_select %p309_p1, %s1530_s27, %s311_s15  }
   0xc   : > { %p1663_p5 = por %p322_p2, %p321_p0  ;;  %p1667_p6 = por %p328_p4, %p327_p3 }
   0xd   : > { %1988 = sst [smem:[#allocation8_spill]] %s1661_s17  ;;  %p1303_p7 = scmp.ge.s32.totalorder %s1534_s28, 1 }
   0xe   : > { %s1990_s19 = scalar_select %p1667_p6, 1, 0 }
   0xf   : > { %p390_p8 = scmp.lt.s32.totalorder %s1534_s28, 3 }
  0x10   : > { %1991 = sst [smem:[#allocation9_spill]] %s1990_s19 }
  0x11   : > { %p391_p9 = pnand %p1303_p7, %p390_p8 }
  0x12   : > { %p434_p10 = scmp.lt.s32.totalorder (!%p391_p9), %s1646_s29, 1  ;;  %v1536_v0 = vmov (!%p391_p9), 0.0   ;;  %v1537_v1 = vmov (!%p391_p9), 0   ;;  %s1992_s4 = sld [smem:[#allocation10_spill]] (!%p391_p9)  ;;  %v539_v3 = vld [vmem:[%s1968_s1 + $0x80] sm:$0xff] (!%p391_p9)  ;;  %v540_v4 = vld [vmem:[%s1968_s1 + $0x88] sm:$0xff] (!%p391_p9) }
  0x13   : > { %394 = sbr.rel (%p391_p9) target bundleno = 1333 (0x535), region = 72  ;;  %516 = vmatprep.mubr.f32.mxu0 (!%p391_p9), %v1536_v0  ;;  %1453 = vset.pattern.permute.xlu0 (!%p391_p9), %v1537_v1  ;;  %v1362_v5 = vpack.c.bf16 (!%p391_p9), %v540_v4, %v539_v3  ;;  %v523_v6 = vld [vmem:[%s1968_s1] sm:$0xff] (!%p391_p9)  ;;  %v524_v7 = vld [vmem:[%s1968_s1 + $0x8] sm:$0xff] (!%p391_p9)  ;;  %v541_v8 = vld [vmem:[%s1968_s1 + $0x90] sm:$0xff] (!%p391_p9)  ;;  %vm448_vm0 = vcmask (!%p391_p9), 64512   ;;  %s1539_s14 = smov (!%p391_p9), 17  }
  0x14   : > { %v1364_v9 = vpack.c.bf16 (!%p391_p9), %v524_v7, %v523_v6  ;;  %v542_v10 = vld [vmem:[%s1968_s1 + $0x98] sm:$0xff] (!%p391_p9)  ;;  %v525_v11 = vld [vmem:[%s1968_s1 + $0x10] sm:$0xff] (!%p391_p9)  ;;  %v543_v14 = vld [vmem:[%s1968_s1 + $0xa0] sm:$0xff] (!%p391_p9)  ;;  %s1540_s20 = smov (!%p391_p9), 1   ;;  %s1541_s21 = smov (!%p391_p9), 16   ;;  %v1545_v59 = vmov (!%p391_p9), 1  }
  0x15   : > { %v526_v12 = vld [vmem:[%s1968_s1 + $0x18] sm:$0xff] (!%p391_p9)  ;;  %1363 = vmatprep.subr.bf16.mxu1 (!%p391_p9), %v1362_v5  ;;  %v1366_v13 = vpack.c.bf16 (!%p391_p9), %v542_v10, %v541_v8  ;;  %v544_v15 = vld [vmem:[%s1968_s1 + $0xa8] sm:$0xff] (!%p391_p9)  ;;  %v441_v16 = vld [vmem:[%s1970_s3] sm:$0x3] (!%p391_p9)  ;;  %s1542_s22 = smov (!%p391_p9), 127   ;;  %s1543_s23 = smov (!%p391_p9), 113   ;;  %1454 = vset.pattern.permute.xlu1 (!%p391_p9), %v1545_v59 }
  0x16   : > { %1365 = vmatpush3.bf16.msra.mxu1 (!%p391_p9), %v1364_v9  ;;  %v1368_v17 = vpack.c.bf16 (!%p391_p9), %v526_v12, %v525_v11  ;;  %v527_v18 = vld [vmem:[%s1968_s1 + $0x20] sm:$0xff] (!%p391_p9)  ;;  %v1370_v21 = vpack.c.bf16 (!%p391_p9), %v544_v15, %v543_v14  ;;  %v528_v22 = vld [vmem:[%s1968_s1 + $0x28] sm:$0xff] (!%p391_p9)  ;;  %v545_v23 = vld [vmem:[%s1968_s1 + $0xb0] sm:$0xff] (!%p391_p9)  ;;  %v1546_v63 = vmov (!%p391_p9), 2   ;;  %v1548_v3 = vmov (!%p391_p9), 6   ;;  %s1552_s30 = smov (!%p391_p9), 111  }
  0x17   : > { %1367 = vmatprep.subr.bf16.mxu1 (!%p391_p9), %v1366_v13  ;;  %v546_v24 = vld [vmem:[%s1968_s1 + $0xb8] sm:$0xff] (!%p391_p9)  ;;  %v1372_v25 = vpack.c.bf16 (!%p391_p9), %v528_v22, %v527_v18  ;;  %v529_v27 = vld [vmem:[%s1968_s1 + $0x30] sm:$0xff] (!%p391_p9)  ;;  %v547_v29 = vld [vmem:[%s1968_s1 + $0xc0] sm:$0xff] (!%p391_p9)  ;;  %v1549_v4 = vmov (!%p391_p9), 4   ;;  %v1550_v5 = vmov (!%p391_p9), 7   ;;  %v1551_v6 = vmov (!%p391_p9), 5  }
  0x18   : > { %v442_v2 = vld [vmem:[%s1992_s4] sm:$0x3] (!%p391_p9)  ;;  %v1374_v26 = vpack.c.bf16 (!%p391_p9), %v546_v24, %v545_v23  ;;  %v530_v28 = vld [vmem:[%s1968_s1 + $0x38] sm:$0xff] (!%p391_p9)  ;;  %v548_v30 = vld [vmem:[%s1968_s1 + $0xc8] sm:$0xff] (!%p391_p9)  ;;  %v1553_v7 = vmov (!%p391_p9), 8   ;;  %v634_v22 = vlaneseq (!%p391_p9)  ;;  %vm891_vm9 = vcmask (!%p391_p9), 1041408  }
  0x19   : > { %445 = vperm.xlu0 (!%p391_p9), %1453, %v442_v2   ;;  %v1376_v31 = vpack.c.bf16 (!%p391_p9), %v530_v28, %v529_v27  ;;  %v1378_v32 = vpack.c.bf16 (!%p391_p9), %v548_v30, %v547_v29  ;;  %v531_v33 = vld [vmem:[%s1968_s1 + $0x40] sm:$0xff] (!%p391_p9)  ;;  %v532_v34 = vld [vmem:[%s1968_s1 + $0x48] sm:$0xff] (!%p391_p9)  ;;  %v549_v35 = vld [vmem:[%s1968_s1 + $0xd0] sm:$0xff] (!%p391_p9)  ;;  %v1547_v2 = vmov (!%p391_p9), 3   ;;  %vm887_vm10 = vcmask (!%p391_p9), 15360   ;;  %s1326_s4 = sshll.u32 (!%p391_p9), %s1646_s29, 8 }
  0x1a   : > { %s435_s15 = scalar_select %p434_p10, %s1646_s29, 1  ;;  %1369 = vmatpush3.bf16.msra.mxu1 %v1368_v17  ;;  %v550_v36 = vld [vmem:[%s1968_s1 + $0xd8] sm:$0xff]  ;;  %v1380_v37 = vpack.c.bf16 %v532_v34, %v531_v33  ;;  %v533_v39 = vld [vmem:[%s1968_s1 + $0x50] sm:$0xff]  ;;  %v551_v41 = vld [vmem:[%s1968_s1 + $0xe0] sm:$0xff]  ;;  %v1837_v27 = vand.u32 127, %v634_v22 }
  0x1b   : > { %1371 = vmatprep.subr.bf16.mxu1 %v1370_v21  ;;  %v1382_v38 = vpack.c.bf16 %v550_v36, %v549_v35  ;;  %v534_v40 = vld [vmem:[%s1968_s1 + $0x58] sm:$0xff]  ;;  %v552_v42 = vld [vmem:[%s1968_s1 + $0xe8] sm:$0xff]  ;;  %v535_v45 = vld [vmem:[%s1968_s1 + $0x60] sm:$0xff]  ;;  %s1554_s29 = smov [#allocation3]  }
  0x1c   : > { %s1325_s16 = sshll.u32 %s435_s15, 4  ;;  %v1384_v43 = vpack.c.bf16 %v534_v40, %v533_v39  ;;  %v1386_v44 = vpack.c.bf16 %v552_v42, %v551_v41  ;;  %v536_v46 = vld [vmem:[%s1968_s1 + $0x68] sm:$0xff]  ;;  %v553_v48 = vld [vmem:[%s1968_s1 + $0xf0] sm:$0xff]  ;;  %v554_v49 = vld [vmem:[%s1968_s1 + $0xf8] sm:$0xff]  ;;  %vm636_vm1 = vcmp.lt.s32.totalorder %v1837_v27, 17  ;;  %vm662_vm2 = vcmp.lt.s32.totalorder %v1837_v27, 16 }
  0x1d   : > { %s438_s24 = scalar_lea.vmem %s1967_s0, %s1325_s16  ;;  %v1388_v47 = vpack.c.bf16 %v536_v46, %v535_v45  ;;  %v1390_v50 = vpack.c.bf16 %v554_v49, %v553_v48  ;;  %v537_v51 = vld [vmem:[%s1968_s1 + $0x70] sm:$0xff]  ;;  %v538_v52 = vld [vmem:[%s1968_s1 + $0x78] sm:$0xff]  ;;  %s1538_s16 = smov 15   ;;  %v555_v8 = vld [vmem:[%s1972_s5] sm:$0x3]  ;;  %vm687_vm3 = vcmp.lt.s32.totalorder %v1837_v27, 15 }
  0x1e   : > { %v1719_v19 = vld [vmem:[%s438_s24 + $0x8] sm:$0xff]  ;;  %v1721_v20 = vld [vmem:[%s438_s24] sm:$0xff]  ;;  %1373 = vmatpush3.bf16.msra.mxu1 %v1372_v25  ;;  %v1392_v53 = vpack.c.bf16 %v538_v52, %v537_v51  ;;  %s1544_s24 = smov 112   ;;  %v1834_v25 = vshrl.u32 %v634_v22, 7  ;;  %vm712_vm4 = vcmp.lt.s32.totalorder %v1837_v27, 1  ;;  %vm755_vm5 = vcmp.lt.s32.totalorder %v1837_v27, 127 }
  0x1f   : > { %452 = vmatprep.subr.mxu0 %v1719_v19  ;;  %1375 = vmatprep.subr.bf16.mxu1 %v1374_v26  ;;  %v1214_v9 = vld [vmem:[%s1979_s12] sm:$0xff]  ;;  %v1851_v33 = vld [vmem:[%s1969_s2 + $0x8] sm:$0xff]  ;;  %vm780_vm6 = vcmp.lt.s32.totalorder %v1837_v27, 113  ;;  %vm805_vm7 = vcmp.lt.s32.totalorder %v1837_v27, 112  ;;  %vm830_vm8 = vcmp.lt.s32.totalorder %v1837_v27, 111 }
  0x20   : > { %453 = vmatpush1.msra.mxu0 %v1721_v20  ;;  %v872_v10 = vld [vmem:[%s1974_s7] sm:$0xff]  ;;  %v641_v26 = vsub.s32 0, %v1834_v25  ;;  %v667_v28 = vsub.s32 1, %v1834_v25  ;;  %v692_v29 = vsub.s32 2, %v1834_v25  ;;  %v717_v48 = vsub.s32 3, %v1834_v25 }
  0x21   : > { %1307 = vmatmul.mubr.msk.f32.vlgmr.msra.gmra.mrb[0].mxu0 %vm448_vm0, %v441_v16  ;;  %v970_v11 = vld [vmem:[%s1976_s9] sm:$0xff]  ;;  %v735_v49 = vsub.s32 4, %v1834_v25 }
  0x22   : > { %960 = vmatprep.mubr.f32.mxu0 %v1536_v0  ;;  %1377 = vmatpush3.bf16.msra.mxu1 %v1376_v31  ;;  %v646_v35 = vrot.slane %v1851_v33, %v641_v26  ;;  %v697_v39 = vrot.slane %v1851_v33, %v692_v29 }
  0x23   : > { %1379 = vmatprep.subr.bf16.mxu1 %v1378_v32  ;;  %v1846_v32 = vld [vmem:[%s1969_s2] sm:$0xff] }
  0x24   : > { %v642_v34 = vrot.slane %v1846_v32, %v641_v26  ;;  %v668_v36 = vrot.slane %v1846_v32, %v667_v28 }
  0x26   : > { %1381 = vmatpush3.bf16.msra.mxu1 %v1380_v37  ;;  %v672_v37 = vrot.slane %v1851_v33, %v667_v28 }
  0x27   : > { %1383 = vmatprep.subr.bf16.mxu1 %v1382_v38  ;;  %v693_v38 = vrot.slane %v1846_v32, %v692_v29 }
  0x2a   : > { %1385 = vmatpush3.bf16.msra.mxu1 %v1384_v43 }
  0x2b   : > { %1387 = vmatprep.subr.bf16.mxu1 %v1386_v44 }
  0x2e   : > { %1389 = vmatpush3.bf16.msra.mxu1 %v1388_v47 }
  0x2f   : > { %1391 = vmatprep.subr.bf16.mxu1 %v1390_v50 }
  0x32   : > { %1393 = vmatpush3.bf16.msra.mxu1 %v1392_v53 }
  0x98   : > { %v446_v54 = vpop.permute.xlu0 %445 }
  0xf4   : > { %v518_v55 = vpop.f32.mrb[0].mxu0 }
  0xf5   : > { %v1790_v56 = vadd.f32 %v518_v55, %v446_v54  ;;  %v520_v57 = vpop.f32.mrb[1].mxu0 }
  0xf6   : > { %v1792_v58 = vadd.f32 %v520_v57, %v446_v54  ;;  %v760_v54 = vsub.s32 5, %v1834_v25 }
  0xf7   : > { %683 = vrot.lane.b32.xlu1 %v1790_v56, %s1538_s16  ;;  %630 = vrot.lane.b32.xlu0 %v1790_v56, %s1539_s14 }
  0xf8   : > { %620 = vmatprep.mubr.f32.mxu1 %v1792_v58 }
  0xf9   : > { %621 = vmatmul.mubr.f32.vlgmr.msra.gmra.mrb[0].mxu1 %v1790_v56 }
  0xfb   : > { %708 = vrot.lane.b32.xlu1 %v1790_v56, %s1540_s20  ;;  %658 = vrot.lane.b32.xlu0 %v1790_v56, %s1541_s21 }
  0xff   : > { %751 = vrot.lane.b32.xlu1 %v1790_v56, %s1542_s22  ;;  %776 = vrot.lane.b32.xlu0 %v1790_v56, %s1543_s23 }
 0x103   : > { %801 = vrot.lane.b32.xlu1 %v1790_v56, %s1544_s24  ;;  %753 = vrot.lane.b32.xlu0 %v1792_v58, %s1542_s22 }
 0x107   : > { %632 = vrot.lane.b32.xlu1 %v1792_v58, %s1539_s14 }
 0x10b   : > { %660 = vrot.lane.b32.xlu1 %v1792_v58, %s1541_s21  ;;  %s1476_s21 = sshll.u32 %s1554_s29, 4  ;;  %s1477_s21 = int_to_ptr.vmem [resolvable:$false] %s1476_s21 }
 0x10c   : > { %s1478_s22 = scalar_lea.vmem %s1477_s21, 512 }
 0x10f   : > { %685 = vrot.lane.b32.xlu1 %v1792_v58, %s1538_s16  ;;  %s1925_s16 = scalar_lea.hbm %s1980_s13, %s1326_s4 }
 0x113   : > { %710 = vrot.lane.b32.xlu1 %v1792_v58, %s1540_s20 }
 0x117   : > { %778 = vrot.lane.b32.xlu1 %v1792_v58, %s1543_s23 }
 0x169   : > { %v684_v12 = vpop.permute.xlu1 %683  ;;  %v631_v16 = vpop.permute.xlu0 %630 }
 0x16d   : > { %v709_v13 = vpop.permute.xlu1 %708  ;;  %v659_v18 = vpop.permute.xlu0 %658 }
 0x171   : > { %v1828_v14 = vpop.permute.xlu1 %751  ;;  %v1832_v23 = vpop.permute.xlu0 %776 }
 0x175   : > { %v754_v30 = vpop.permute.xlu0 %753 }
 0x1cc   : > { %v1359_v60 = vpop.f32.mrb[0].mxu1 }
 0x1cd   : > { %v1360_v61 = vpop.f32.mrb[1].mxu1 }
 0x1ce   : > { %v1361_v62 = vadd.f32 %v1360_v61, %v1359_v60 }
 0x1d0   : > { %676 = vperm.xlu1 %1454, %v1361_v62   ;;  %651 = vperm.xlu0 %1453, %v1361_v62  }
 0x1d4   : > { %1455 = vset.pattern.permute.xlu1 %v1546_v63  ;;  %1456 = vset.pattern.permute.xlu0 %v1547_v2 }
 0x1d5   : > { %701 = vperm.xlu1 %1455, %v1361_v62   ;;  %726 = vperm.xlu0 %1456, %v1361_v62  }
 0x1d9   : > { %1459 = vset.pattern.permute.xlu1 %v1548_v3  ;;  %1457 = vset.pattern.permute.xlu0 %v1549_v4  ;;  %v718_v3 = vrot.slane %v1846_v32, %v717_v48  ;;  %v722_v4 = vrot.slane %v1851_v33, %v717_v48 }
 0x1da   : > { %794 = vperm.xlu1 %1459, %v1361_v62   ;;  %744 = vperm.xlu0 %1457, %v1361_v62  }
 0x1de   : > { %1460 = vset.pattern.permute.xlu1 %v1550_v5  ;;  %1458 = vset.pattern.permute.xlu0 %v1551_v6 }
 0x1df   : > { %819 = vperm.xlu1 %1460, %v1361_v62   ;;  %769 = vperm.xlu0 %1458, %v1361_v62  }
 0x1e3   : > { %803 = vrot.lane.b32.xlu1 %v1792_v58, %s1544_s24  ;;  %826 = vrot.lane.b32.xlu0 %v1790_v56, %s1552_s30  ;;  %s431_s24 = sand.u32 1, %s1526_s26  }
 0x1e4   : > { %1461 = vset.pattern.permute.xlu0 %v1553_v7  ;;  %1463 = vset.pattern.permute.xlu1 %v1537_v1  ;;  %s1227_s14 = scalar_lea.sflag [#allocation4], %s431_s24 }
 0x1e7   : > { %828 = vrot.lane.b32.xlu1 %v1792_v58, %s1552_s30  ;;  %844 = vperm.xlu0 %1461, %v1361_v62   ;;  %s1304_s30 = sshll.u32 %s431_s24, 4 }
 0x1e8   : > { %s433_s15 = scalar_lea.vmem [#allocation3], %s1304_s30 }
 0x1e9   : > { %s1241_s17 = sshll.u32 %s433_s15, 4  ;;  %s1927_s17 = int_to_ptr.vmem [resolvable:$true] %s1241_s17 }
 0x1ea   : > { %s1472_s20 = scalar_lea.vmem %s1927_s17, 256  ;;  %p1479_p0 = scmp.lt.s32.totalorder %s1927_s17, %s1477_s21 }
 0x1eb   : > { %1462 = vset.pattern.permute.xlu0 %v1537_v1  ;;  %875 = vperm.xlu1 %1463, %v872_v10   ;;  %v1830_v1 = vpop.permute.xlu1 %801  ;;  %v740_v10 = vrot.slane %v1851_v33, %v735_v49  ;;  %p1473_p11 = scmp.ne.s32.totalorder %s1927_s17, %s1472_s20  ;;  %p1480_p1 = scmp.lt.s32.totalorder %s1478_s22, %s1472_s20 }
 0x1ec   : > { %853 = vperm.xlu0 %1462, %v555_v8  }
 0x1ed   : > { %p1474_p12 = pnand %p1473_p11, %p1663_p5  ;;  %p1481_p2 = por %p1480_p1, %p1479_p0 }
 0x1ef   : > { %973 = vperm.xlu1 %1463, %v970_v11   ;;  %v633_v15 = vpop.permute.xlu1 %632  ;;  %v761_v11 = vrot.slane %v1846_v32, %v760_v54  ;;  %p1475_p13 = pneg %p1474_p12 }
 0x1f0   : > { %1217 = vperm.xlu0 %1462, %v1214_v9   ;;  %v637_v40 = vsel %vm636_vm1, %v631_v16, %v633_v15  ;;  %v638_v41 = vsel %vm636_vm1, %v633_v15, %v631_v16  ;;  %v736_v9 = vrot.slane %v1846_v32, %v735_v49  ;;  %v765_v16 = vrot.slane %v1851_v33, %v760_v54 }
 0x1f1   : > { %v647_v50 = vmul.f32 %v642_v34, %v638_v41  ;;  %v648_v51 = vmul.f32 %v646_v35, %v637_v40  ;;  %v742_v35 = vmul.f32 %v740_v10, %v1792_v58  ;;  %p1482_p3 = pnand %p1481_p2, %p1475_p13 }
 0x1f2   : > { %v741_v34 = vmul.f32 %v736_v9, %v1790_v56 }
 0x1f3   : > { %v661_v17 = vpop.permute.xlu1 %660 }
 0x1f4   : > { %v663_v42 = vsel %vm662_vm2, %v659_v18, %v661_v17  ;;  %v664_v43 = vsel %vm662_vm2, %v661_v17, %v659_v18  ;;  %v756_v17 = vsel %vm755_vm5, %v1828_v14, %v754_v30  ;;  %v757_v18 = vsel %vm755_vm5, %v754_v30, %v1828_v14 }
 0x1f5   : > { %v673_v52 = vmul.f32 %v668_v36, %v664_v43  ;;  %v674_v53 = vmul.f32 %v672_v37, %v663_v42  ;;  %v767_v14 = vmul.f32 %v765_v16, %v757_v18 }
 0x1f7   : > { %v686_v21 = vpop.permute.xlu1 %685 }
 0x1f8   : > { %v688_v46 = vsel %vm687_vm3, %v684_v12, %v686_v21  ;;  %v689_v47 = vsel %vm687_vm3, %v686_v21, %v684_v12  ;;  %v785_v21 = vsub.s32 6, %v1834_v25 }
 0x1f9   : > { %v698_v55 = vmul.f32 %v693_v38, %v689_v47  ;;  %v699_v57 = vmul.f32 %v697_v39, %v688_v46  ;;  %v810_v38 = vsub.s32 7, %v1834_v25  ;;  %v766_v39 = vmul.f32 %v761_v11, %v756_v17 }
 0x1fa   : > { %v786_v30 = vrot.slane %v1846_v32, %v785_v21  ;;  %v790_v56 = vrot.slane %v1851_v33, %v785_v21 }
 0x1fb   : > { %v711_v24 = vpop.permute.xlu1 %710  ;;  %v811_v48 = vrot.slane %v1846_v32, %v810_v38  ;;  %v815_v49 = vrot.slane %v1851_v33, %v810_v38  ;;  %v1308_v32 = vld [vmem:[%s1969_s2 + $0x10] ss:$0 sm:$0xff]  ;;  %v1309_v33 = vld [vmem:[%s1969_s2 + $0x18] ss:$0 sm:$0xff] }
 0x1fc   : > { %v713_v7 = vsel %vm712_vm4, %v709_v13, %v711_v24  ;;  %v714_v8 = vsel %vm712_vm4, %v711_v24, %v709_v13 }
 0x1fd   : > { %v723_v28 = vmul.f32 %v718_v3, %v714_v8  ;;  %v724_v13 = vmul.f32 %v722_v4, %v713_v7 }
 0x1ff   : > { %v1841_v31 = vpop.permute.xlu1 %778 }
 0x200   : > { %v781_v58 = vsel %vm780_vm6, %v1832_v23, %v1841_v31  ;;  %v782_v46 = vsel %vm780_vm6, %v1841_v31, %v1832_v23 }
 0x24f   : > { %v677_v44 = vpop.permute.xlu1 %676  ;;  %v652_v45 = vpop.permute.xlu0 %651 }
 0x250   : > { %v679_v59 = vmul.f32 %v677_v44, %v673_v52  ;;  %v680_v60 = vmul.f32 %v677_v44, %v674_v53  ;;  %v654_v61 = vmul.f32 %v652_v45, %v647_v50  ;;  %v655_v62 = vmul.f32 %v652_v45, %v648_v51 }
 0x251   : > { %v791_v50 = vmul.f32 %v786_v30, %v781_v58  ;;  %v1065_v30 = vld [vmem:[%s1978_s11] sm:$0xff] }
 0x252   : > { %v681_v12 = vadd.f32 %v679_v59, %v654_v61  ;;  %v682_v15 = vadd.f32 %v680_v60, %v655_v62 }
 0x254   : > { %v702_v63 = vpop.permute.xlu1 %701  ;;  %v727_v2 = vpop.permute.xlu0 %726 }
 0x255   : > { %v704_v5 = vmul.f32 %v702_v63, %v698_v55  ;;  %v705_v6 = vmul.f32 %v702_v63, %v699_v57  ;;  %v729_v36 = vmul.f32 %v727_v2, %v723_v28  ;;  %v730_v37 = vmul.f32 %v727_v2, %v724_v13 }
 0x256   : > { %v792_v55 = vmul.f32 %v790_v56, %v782_v46 }
 0x257   : > { %v706_v24 = vadd.f32 %v704_v5, %v681_v12  ;;  %v707_v29 = vadd.f32 %v705_v6, %v682_v15 }
 0x259   : > { %v795_v22 = vpop.permute.xlu1 %794  ;;  %v745_v26 = vpop.permute.xlu0 %744  ;;  %v731_v40 = vadd.f32 %v729_v36, %v706_v24  ;;  %v732_v41 = vadd.f32 %v730_v37, %v707_v29  ;;  %v871_v24 = vld [vmem:[%s1973_s6] sm:$0xff] }
 0x25a   : > { %v747_v42 = vmul.f32 %v745_v26, %v741_v34  ;;  %v748_v43 = vmul.f32 %v745_v26, %v742_v35  ;;  %v797_v62 = vmul.f32 %v795_v22, %v791_v50  ;;  %v798_v63 = vmul.f32 %v795_v22, %v792_v55 }
 0x25c   : > { %v749_v51 = vadd.f32 %v747_v42, %v731_v40  ;;  %v750_v52 = vadd.f32 %v748_v43, %v732_v41 }
 0x25e   : > { %v820_v44 = vpop.permute.xlu1 %819  ;;  %v770_v45 = vpop.permute.xlu0 %769 }
 0x25f   : > { %v772_v25 = vmul.f32 %v770_v45, %v766_v39  ;;  %v773_v47 = vmul.f32 %v770_v45, %v767_v14  ;;  %v969_v14 = vld [vmem:[%s1975_s8] sm:$0xff] }
 0x261   : > { %v774_v23 = vadd.f32 %v772_v25, %v749_v51  ;;  %v775_v31 = vadd.f32 %v773_v47, %v750_v52 }
 0x262   : > { %v804_v53 = vpop.permute.xlu1 %803  ;;  %v827_v54 = vpop.permute.xlu0 %826 }
 0x263   : > { %v806_v57 = vsel %vm805_vm7, %v1830_v1, %v804_v53  ;;  %v807_v59 = vsel %vm805_vm7, %v804_v53, %v1830_v1  ;;  %v799_v6 = vadd.f32 %v797_v62, %v774_v23  ;;  %v800_v7 = vadd.f32 %v798_v63, %v775_v31 }
 0x264   : > { %v816_v60 = vmul.f32 %v811_v48, %v806_v57  ;;  %v817_v61 = vmul.f32 %v815_v49, %v807_v59  ;;  %v1064_v49 = vld [vmem:[%s1977_s10] sm:$0xff] }
 0x266   : > { %v822_v2 = vmul.f32 %v820_v44, %v816_v60  ;;  %v823_v3 = vmul.f32 %v820_v44, %v817_v61  ;;  %v829_v4 = vpop.permute.xlu1 %828  ;;  %v845_v27 = vpop.permute.xlu0 %844 }
 0x267   : > { %v831_v1 = vsel %vm830_vm8, %v827_v54, %v829_v4  ;;  %v832_v5 = vsel %vm830_vm8, %v829_v4, %v827_v54 }
 0x268   : > { %v841_v8 = vmul.f32 %v1308_v32, %v831_v1  ;;  %v842_v9 = vmul.f32 %v1309_v33, %v832_v5  ;;  %v824_v12 = vadd.f32 %v822_v2, %v799_v6  ;;  %v825_v15 = vadd.f32 %v823_v3, %v800_v7 }
 0x26a   : > { %v847_v10 = vmul.f32 %v845_v27, %v841_v8  ;;  %v848_v11 = vmul.f32 %v845_v27, %v842_v9  ;;  %v876_v29 = vpop.permute.xlu1 %875 }
 0x26b   : > { %v854_v18 = vpop.permute.xlu0 %853 }
 0x26c   : > { %v849_v16 = vadd.f32 %v847_v10, %v824_v12  ;;  %v850_v17 = vadd.f32 %v848_v11, %v825_v15 }
 0x26e   : > { %v856_v21 = vadd.f32 %v854_v18, %v849_v16  ;;  %v857_v26 = vadd.f32 %v854_v18, %v850_v17  ;;  %v974_v40 = vpop.permute.xlu1 %973 }
 0x26f   : > { %v1218_v50 = vpop.permute.xlu0 %1217 }
 0x270   : > { %v860_v22 = vcombine.low %v856_v21, %v857_v26 }
 0x272   : > { %1310 = vst.sshfl [vmem:[#allocation2] sm:$0x33 pattern:$0x76325410] %v860_v22 }
 0x279   : > { %v1311_v28 = vld.sshfl [vmem:[#allocation2] sm:$0x33 pattern:$0x76325410] }
 0x27a   : > { %v886_v13 = vcombine.high %v1311_v28, %v1311_v28 }
 0x27c   : > { %1312 = vmatprep.subr.msk.mxu0 %vm891_vm9, %v886_v13 }
 0x27d   : > { %1313 = vmatpush1.msk.msra.mxu0 %vm891_vm9, %v1311_v28 }
 0x27e   : > { %1314 = vmatmul.mubr.msk.f32.vlgmr.msra.gmra.mrb[2].mxu0 %vm887_vm10, %v871_v24 }
 0x27f   : > { %1043 = vmatprep.mubr.f32.mxu0 %v1536_v0 }
 0x351   : > { %v962_v34 = vpop.f32.mrb[2].mxu0 }
 0x352   : > { %v963_v35 = vadd.f32 %v962_v34, %v876_v29  ;;  %v964_v36 = vpop.f32.mrb[3].mxu0 }
 0x353   : > { %v965_v37 = vadd.f32 %v964_v36, %v876_v29 }
 0x354   : > { %v967_v39 = vsub.f32 %v1721_v20, %v963_v35 }
 0x355   : > { %v968_v38 = vsub.f32 %v1719_v19, %v965_v37 }
 0x357   : > { %979 = vmatprep.subr.mxu0 %v968_v38 }
 0x358   : > { %980 = vmatpush1.msra.mxu0 %v967_v39 }
 0x359   : > { %1315 = vmatmul.mubr.msk.f32.vlgmr.msra.gmra.mrb[4].mxu0 %vm448_vm0, %v969_v14  ;;  %1069 = vmatprep.subr.mxu0 %v1719_v19 }
 0x35a   : > { %1070 = vmatpush1.msra.mxu0 %v1721_v20  ;;  %1133 = vmatprep.mubr.f32.mxu0 %v1536_v0 }
 0x35d   : > { %1318 = vmatmul.mubr.msk.f32.vlgmr.msra.gmra.mrb[6].mxu0 %vm448_vm0, %v1065_v30 }
 0x35e   : > { %1207 = vmatprep.mubr.f32.mxu0 %v1536_v0 }
 0x42c   : > { %v1045_v41 = vpop.f32.mrb[4].mxu0 }
 0x42d   : > { %v1046_v42 = vadd.f32 %v1045_v41, %v974_v40  ;;  %v1047_v43 = vpop.f32.mrb[5].mxu0 }
 0x42e   : > { %v1048_v44 = vadd.f32 %v1047_v43, %v974_v40 }
 0x42f   : > { %v1316_v45 = vmul.f32 -1.442695, %v1046_v42 }
 0x430   : > { %v1317_v56 = vmul.f32 -1.442695, %v1048_v44 }
 0x431   : > { %1464 = vpow2.f32 %v1316_v45 }
 0x432   : > { %1466 = vpow2.f32 %v1317_v56 }
 0x43b   : > { %v1465_v19 = vpop.eup %1464 }
 0x43c   : > { %v1467_v20 = vpop.eup %1466  ;;  %v1056_v58 = vadd.f32 1.0, %v1465_v19 }
 0x43d   : > { %v1057_v46 = vadd.f32 1.0, %v1467_v20 }
 0x43e   : > { %1468 = vrcp.f32 %v1056_v58 }
 0x43f   : > { %1470 = vrcp.f32 %v1057_v46 }
 0x448   : > { %v1469_v25 = vpop.eup %1468 }
 0x449   : > { %v1471_v47 = vpop.eup %1470  ;;  %v1062_v48 = vmul.f32 %v1469_v25, %v963_v35 }
 0x44a   : > { %v1063_v0 = vmul.f32 %v1471_v47, %v965_v37 }
 0x44c   : > { %1143 = vmatprep.subr.mxu0 %v1063_v0 }
 0x44d   : > { %1144 = vmatpush1.msra.mxu0 %v1062_v48 }
 0x44e   : > { %1319 = vmatmul.mubr.msk.f32.vlgmr.msra.gmra.mrb[6].mxu0 %vm448_vm0, %v1064_v49 }
 0x521   : > { %v1209_v51 = vpop.f32.mrb[6].mxu0 }
 0x522   : > { %v1220_v52 = vadd.f32 %v1218_v50, %v1209_v51  ;;  %v1211_v53 = vpop.f32.mrb[7].mxu0 }
 0x523   : > { %v1221_v54 = vadd.f32 %v1218_v50, %v1211_v53 }
 0x524   : > { %v1222_v55 = vmax.f32 %v1220_v52, 0.0 }
 0x525   : > { %v1223_v57 = vmax.f32 %v1221_v54, 0.0 }
 0x526   : > { %1224 = vst [vmem:[%s433_s15] sm:$0xff] %v1222_v55 }
 0x527   : > { %1225 = vst [vmem:[%s433_s15 + $0x8] sm:$0xff] %v1223_v57 }
 0x528   : > { %1485 = shalt.err (!%p1482_p3)
}
 0x529   : > { %s1486_s23 = scalar_lea.hbm %s1925_s16, 256  ;;  %s1490_s4 = scalar_lea.hbm %s1980_s13, 512 }
 0x52a   : > { %p1487_p4 = scmp.ne.s32.totalorder %s1925_s16, %s1486_s23  ;;  %p1491_p9 = scmp.lt.u32.totalorder %s1925_s16, %s1980_s13 }
 0x52b   : > { %p1492_p10 = scmp.lt.u32.totalorder %s1490_s4, %s1486_s23  ;;  %p1494_p12 = scmp.lt.u32.totalorder %s1486_s23, %s1925_s16 }
 0x52c   : > { %p1488_p7 = pnand %p1487_p4, %p1663_p5 }
 0x52d   : > { %p1493_p11 = por %p1492_p10, %p1491_p9 }
 0x52e   : > { %p1489_p8 = pneg %p1488_p7 }
 0x52f   : > { %p1495_p13 = por %p1494_p12, %p1493_p11 }
 0x531   : > { %p1496_p0 = pnand %p1495_p13, %p1489_p8 }
 0x533   : > { %1499 = shalt.err (!%p1496_p0)
}
 0x534   : > { %1396 = dma.vmem_to_hbm [thread:$0]  (%p1663_p5), %s1927_s17, 256, %s1925_s16, %s1227_s14  }
 0x535 PF: > { %p1402_p1 = scmp.ge.s32.totalorder %s1534_s28, 2  ;;  %s1253_s20 = sand.u32 1, %s1522_s25  }
 0x536   : > { %s1254_s29 = scalar_lea.sflag [#allocation4], %s1253_s20 }
 0x537   : > { %p1399_p2 = pnand %p1402_p1, %p1667_p6 }
 0x539   : > { %1517 = dma.done.wait (!%p1399_p2), %s1254_s29, 256  }
 0x53a   : > { %1519 = vsyncadd (!%p1399_p2), %s1254_s29, 4294967040  ;;  %s1994_s28 = sld [smem:[#allocation7_spill]]  ;;  %s1995_s21 = sld [smem:[#allocation6_spill]] }
 0x53b   : > { %s1996_s27 = sld [smem:[#allocation8_spill]]  ;;  %s1997_s25 = smov %s1526_s26 }
 0x540   : > { %p23_p3 = scmp.ge.s32.totalorder %s1994_s28, 4   ;;  %s1998_s26 = smov %s1995_s21 }
 0x542   :  { %25 = sbr.rel (!%p23_p3) target bundleno = 5 (0x5), region = 107 }
 0x549   :  { %1259 = vsyncpa [#allocation4], 1 }
 0x54a   :  { %1261 = vsyncpa [#allocation4 + $0x1], 1 }

</bundles_post_ra>
